<compile_context>
chip_gen: v6e
topology: v6e:2x2x1
jax: 0.10.0
libtpu: 0.0.40
codegen_flags: <defaults>
</compile_context>

<pallas_src>
import math

import jax
import jax.numpy as jnp
from jax.experimental import pallas as pl
from jax.experimental.pallas import tpu as pltpu

N_NODES = 64        # number of graph nodes
N_FEATS = 32        # dataset.num_features
HIDDEN = 16         # args.hidden
N_CLASSES = 8       # dataset.num_classes
APPNP_K = 10        # args.K
APPNP_ALPHA = 0.1   # args.alpha

VMEM_SPEC = pl.BlockSpec(memory_space=pltpu.MemorySpace.VMEM)


# --------------------------- Pallas kernel ----------------------------------

def _appnp_net_kernel(a_ref, x_ref, w1_ref, b1_ref, w2_ref, b2_ref, o_ref):
    """Fused forward:
       h  = relu(x @ W1 + b1)              (dropout == identity at inference)
       z0 = h @ W2 + b2
       z  = APPNP_K steps of  z <- (1-alpha) * A_hat @ z + alpha * z0
    """
    a = a_ref[...]

    # lin1 + ReLU
    h = jnp.maximum(
        jnp.dot(x_ref[...], w1_ref[...], preferred_element_type=jnp.float32)
        + b1_ref[...],
        0.0,
    )

    # lin2
    z0 = jnp.dot(h, w2_ref[...], preferred_element_type=jnp.float32) + b2_ref[...]

    # APPNP propagation with teleport (personalized PageRank), K static & small
    z = z0
    for _ in range(APPNP_K):
        z = ((1.0 - APPNP_ALPHA)
             * jnp.dot(a, z, preferred_element_type=jnp.float32)
             + APPNP_ALPHA * z0)

    o_ref[...] = z


def appnp_net_forward_kernel(a_hat, x, w1, b1, w2, b2):
    n = x.shape[0]
    return pl.pallas_call(
        _appnp_net_kernel,
        out_shape=jax.ShapeDtypeStruct((n, N_CLASSES), jnp.float32),
        in_specs=[VMEM_SPEC] * 6,
        out_specs=VMEM_SPEC,
    )(a_hat, x, w1, b1, w2, b2)


# ------------------------------- JAX glue ------------------------------------

def gcn_normalize(edge_index, num_nodes):
    """edge_index [2, E] -> dense A_hat = D^-1/2 (A + I) D^-1/2 (undirected)."""
    src, dst = edge_index[0], edge_index[1]
    a = jnp.zeros((num_nodes, num_nodes), jnp.float32).at[dst, src].set(1.0)
    a = jnp.maximum(a, a.T)                                   # symmetrize
    a = a * (1.0 - jnp.eye(num_nodes, dtype=jnp.float32))     # drop self-edges
    a = a + jnp.eye(num_nodes, dtype=jnp.float32)             # add self-loops
    deg = a.sum(axis=1)
    d_inv_sqrt = jax.lax.rsqrt(deg)
    return d_inv_sqrt[:, None] * a * d_inv_sqrt[None, :]


def init_params(key):
    k1, k2, k3, k4 = jax.random.split(key, 4)

    def u(k, shape, scale):
        return jax.random.uniform(k, shape, jnp.float32, -scale, scale)

    s1 = 1.0 / math.sqrt(N_FEATS)
    s2 = 1.0 / math.sqrt(HIDDEN)
    return {
        # Linear(num_features -> hidden), stored transposed so kernel does x @ W
        "w1": u(k1, (N_FEATS, HIDDEN), s1),
        "b1": u(k2, (1, HIDDEN), s1),
        # Linear(hidden -> num_classes), stored transposed
        "w2": u(k3, (HIDDEN, N_CLASSES), s2),
        "b2": u(k4, (1, N_CLASSES), s2),
    }


@jax.jit
def appnp_net_forward(x, a_hat, params):
    # dropout(p, training=False) is the identity -> single fused kernel launch.
    return appnp_net_forward_kernel(
        a_hat, x, params["w1"], params["b1"], params["w2"], params["b2"]
    )


if __name__ == "__main__":
    key = jax.random.PRNGKey(0)
    kx, ke, kp = jax.random.split(key, 3)

    x = jax.random.normal(kx, (N_NODES, N_FEATS), jnp.float32)      # data.x
    n_edges = 200
    edge_index = jax.random.randint(ke, (2, n_edges), 0, N_NODES)   # data.edge_index

    a_hat = gcn_normalize(edge_index, N_NODES)
    params = init_params(kp)

    out = appnp_net_forward(x, a_hat, params)
    out = jax.block_until_ready(out)
    assert out.shape == (N_NODES, N_CLASSES)
    assert bool(jnp.all(jnp.isfinite(out)))
    print("KERNEL_OK")
</pallas_src>

<mosaic_0001>
module attributes {stable_mosaic.version = 11 : i64} {
  func.func @_appnp_net_kernel(%arg0: memref<64x64xf32, #tpu.memory_space<vmem>>, %arg1: memref<64x32xf32, #tpu.memory_space<vmem>>, %arg2: memref<32x16xf32, #tpu.memory_space<vmem>>, %arg3: memref<1x16xf32, #tpu.memory_space<vmem>>, %arg4: memref<16x8xf32, #tpu.memory_space<vmem>>, %arg5: memref<1x8xf32, #tpu.memory_space<vmem>>, %arg6: memref<64x8xf32, #tpu.memory_space<vmem>>) attributes {dimension_semantics = [], scalar_prefetch = 0 : i64, scratch_operands = 0 : i64, tpu.core_type = #tpu.core_type<tc>} {
    %c0 = arith.constant 0 : index
    %c0_0 = arith.constant 0 : index
    %0 = vector.load %arg0[%c0, %c0_0] : memref<64x64xf32, #tpu.memory_space<vmem>>, vector<64x64xf32>
    %c0_1 = arith.constant 0 : index
    %c0_2 = arith.constant 0 : index
    %1 = vector.load %arg1[%c0_1, %c0_2] : memref<64x32xf32, #tpu.memory_space<vmem>>, vector<64x32xf32>
    %c0_3 = arith.constant 0 : index
    %c0_4 = arith.constant 0 : index
    %2 = vector.load %arg2[%c0_3, %c0_4] : memref<32x16xf32, #tpu.memory_space<vmem>>, vector<32x16xf32>
    %cst = arith.constant dense<0.000000e+00> : vector<64x16xf32>
    %3 = tpu.matmul %1, %2, %cst {dimension_numbers = #tpu.dot_dimension_numbers<[1], [0], [0], [1], [0, 0, 1, 1], [], []>} : vector<64x32xf32>, vector<32x16xf32>, vector<64x16xf32> -> vector<64x16xf32>
    %c0_5 = arith.constant 0 : index
    %c0_6 = arith.constant 0 : index
    %4 = vector.load %arg3[%c0_5, %c0_6] : memref<1x16xf32, #tpu.memory_space<vmem>>, vector<1x16xf32>
    %5 = vector.broadcast %4 : vector<1x16xf32> to vector<64x16xf32>
    %6 = arith.addf %3, %5 : vector<64x16xf32>
    %cst_7 = arith.constant 0.000000e+00 : f32
    %7 = vector.broadcast %cst_7 : f32 to vector<64x16xf32>
    %8 = arith.maximumf %6, %7 : vector<64x16xf32>
    %c0_8 = arith.constant 0 : index
    %c0_9 = arith.constant 0 : index
    %9 = vector.load %arg4[%c0_8, %c0_9] : memref<16x8xf32, #tpu.memory_space<vmem>>, vector<16x8xf32>
    %cst_10 = arith.constant dense<0.000000e+00> : vector<64x8xf32>
    %10 = tpu.matmul %8, %9, %cst_10 {dimension_numbers = #tpu.dot_dimension_numbers<[1], [0], [0], [1], [0, 0, 1, 1], [], []>} : vector<64x16xf32>, vector<16x8xf32>, vector<64x8xf32> -> vector<64x8xf32>
    %c0_11 = arith.constant 0 : index
    %c0_12 = arith.constant 0 : index
    %11 = vector.load %arg5[%c0_11, %c0_12] : memref<1x8xf32, #tpu.memory_space<vmem>>, vector<1x8xf32>
    %12 = vector.broadcast %11 : vector<1x8xf32> to vector<64x8xf32>
    %13 = arith.addf %10, %12 : vector<64x8xf32>
    %cst_13 = arith.constant dense<0.000000e+00> : vector<64x8xf32>
    %14 = tpu.matmul %0, %13, %cst_13 {dimension_numbers = #tpu.dot_dimension_numbers<[1], [0], [0], [1], [0, 0, 1, 1], [], []>} : vector<64x64xf32>, vector<64x8xf32>, vector<64x8xf32> -> vector<64x8xf32>
    %cst_14 = arith.constant 0.899999976 : f32
    %15 = vector.broadcast %cst_14 : f32 to vector<64x8xf32>
    %16 = arith.mulf %15, %14 : vector<64x8xf32>
    %cst_15 = arith.constant 1.000000e-01 : f32
    %17 = vector.broadcast %cst_15 : f32 to vector<64x8xf32>
    %18 = arith.mulf %17, %13 : vector<64x8xf32>
    %19 = arith.addf %16, %18 : vector<64x8xf32>
    %cst_16 = arith.constant dense<0.000000e+00> : vector<64x8xf32>
    %20 = tpu.matmul %0, %19, %cst_16 {dimension_numbers = #tpu.dot_dimension_numbers<[1], [0], [0], [1], [0, 0, 1, 1], [], []>} : vector<64x64xf32>, vector<64x8xf32>, vector<64x8xf32> -> vector<64x8xf32>
    %cst_17 = arith.constant 0.899999976 : f32
    %21 = vector.broadcast %cst_17 : f32 to vector<64x8xf32>
    %22 = arith.mulf %21, %20 : vector<64x8xf32>
    %cst_18 = arith.constant 1.000000e-01 : f32
    %23 = vector.broadcast %cst_18 : f32 to vector<64x8xf32>
    %24 = arith.mulf %23, %13 : vector<64x8xf32>
    %25 = arith.addf %22, %24 : vector<64x8xf32>
    %cst_19 = arith.constant dense<0.000000e+00> : vector<64x8xf32>
    %26 = tpu.matmul %0, %25, %cst_19 {dimension_numbers = #tpu.dot_dimension_numbers<[1], [0], [0], [1], [0, 0, 1, 1], [], []>} : vector<64x64xf32>, vector<64x8xf32>, vector<64x8xf32> -> vector<64x8xf32>
    %cst_20 = arith.constant 0.899999976 : f32
    %27 = vector.broadcast %cst_20 : f32 to vector<64x8xf32>
    %28 = arith.mulf %27, %26 : vector<64x8xf32>
    %cst_21 = arith.constant 1.000000e-01 : f32
    %29 = vector.broadcast %cst_21 : f32 to vector<64x8xf32>
    %30 = arith.mulf %29, %13 : vector<64x8xf32>
    %31 = arith.addf %28, %30 : vector<64x8xf32>
    %cst_22 = arith.constant dense<0.000000e+00> : vector<64x8xf32>
    %32 = tpu.matmul %0, %31, %cst_22 {dimension_numbers = #tpu.dot_dimension_numbers<[1], [0], [0], [1], [0, 0, 1, 1], [], []>} : vector<64x64xf32>, vector<64x8xf32>, vector<64x8xf32> -> vector<64x8xf32>
    %cst_23 = arith.constant 0.899999976 : f32
    %33 = vector.broadcast %cst_23 : f32 to vector<64x8xf32>
    %34 = arith.mulf %33, %32 : vector<64x8xf32>
    %cst_24 = arith.constant 1.000000e-01 : f32
    %35 = vector.broadcast %cst_24 : f32 to vector<64x8xf32>
    %36 = arith.mulf %35, %13 : vector<64x8xf32>
    %37 = arith.addf %34, %36 : vector<64x8xf32>
    %cst_25 = arith.constant dense<0.000000e+00> : vector<64x8xf32>
    %38 = tpu.matmul %0, %37, %cst_25 {dimension_numbers = #tpu.dot_dimension_numbers<[1], [0], [0], [1], [0, 0, 1, 1], [], []>} : vector<64x64xf32>, vector<64x8xf32>, vector<64x8xf32> -> vector<64x8xf32>
    %cst_26 = arith.constant 0.899999976 : f32
    %39 = vector.broadcast %cst_26 : f32 to vector<64x8xf32>
    %40 = arith.mulf %39, %38 : vector<64x8xf32>
    %cst_27 = arith.constant 1.000000e-01 : f32
    %41 = vector.broadcast %cst_27 : f32 to vector<64x8xf32>
    %42 = arith.mulf %41, %13 : vector<64x8xf32>
    %43 = arith.addf %40, %42 : vector<64x8xf32>
    %cst_28 = arith.constant dense<0.000000e+00> : vector<64x8xf32>
    %44 = tpu.matmul %0, %43, %cst_28 {dimension_numbers = #tpu.dot_dimension_numbers<[1], [0], [0], [1], [0, 0, 1, 1], [], []>} : vector<64x64xf32>, vector<64x8xf32>, vector<64x8xf32> -> vector<64x8xf32>
    %cst_29 = arith.constant 0.899999976 : f32
    %45 = vector.broadcast %cst_29 : f32 to vector<64x8xf32>
    %46 = arith.mulf %45, %44 : vector<64x8xf32>
    %cst_30 = arith.constant 1.000000e-01 : f32
    %47 = vector.broadcast %cst_30 : f32 to vector<64x8xf32>
    %48 = arith.mulf %47, %13 : vector<64x8xf32>
    %49 = arith.addf %46, %48 : vector<64x8xf32>
    %cst_31 = arith.constant dense<0.000000e+00> : vector<64x8xf32>
    %50 = tpu.matmul %0, %49, %cst_31 {dimension_numbers = #tpu.dot_dimension_numbers<[1], [0], [0], [1], [0, 0, 1, 1], [], []>} : vector<64x64xf32>, vector<64x8xf32>, vector<64x8xf32> -> vector<64x8xf32>
    %cst_32 = arith.constant 0.899999976 : f32
    %51 = vector.broadcast %cst_32 : f32 to vector<64x8xf32>
    %52 = arith.mulf %51, %50 : vector<64x8xf32>
    %cst_33 = arith.constant 1.000000e-01 : f32
    %53 = vector.broadcast %cst_33 : f32 to vector<64x8xf32>
    %54 = arith.mulf %53, %13 : vector<64x8xf32>
    %55 = arith.addf %52, %54 : vector<64x8xf32>
    %cst_34 = arith.constant dense<0.000000e+00> : vector<64x8xf32>
    %56 = tpu.matmul %0, %55, %cst_34 {dimension_numbers = #tpu.dot_dimension_numbers<[1], [0], [0], [1], [0, 0, 1, 1], [], []>} : vector<64x64xf32>, vector<64x8xf32>, vector<64x8xf32> -> vector<64x8xf32>
    %cst_35 = arith.constant 0.899999976 : f32
    %57 = vector.broadcast %cst_35 : f32 to vector<64x8xf32>
    %58 = arith.mulf %57, %56 : vector<64x8xf32>
    %cst_36 = arith.constant 1.000000e-01 : f32
    %59 = vector.broadcast %cst_36 : f32 to vector<64x8xf32>
    %60 = arith.mulf %59, %13 : vector<64x8xf32>
    %61 = arith.addf %58, %60 : vector<64x8xf32>
    %cst_37 = arith.constant dense<0.000000e+00> : vector<64x8xf32>
    %62 = tpu.matmul %0, %61, %cst_37 {dimension_numbers = #tpu.dot_dimension_numbers<[1], [0], [0], [1], [0, 0, 1, 1], [], []>} : vector<64x64xf32>, vector<64x8xf32>, vector<64x8xf32> -> vector<64x8xf32>
    %cst_38 = arith.constant 0.899999976 : f32
    %63 = vector.broadcast %cst_38 : f32 to vector<64x8xf32>
    %64 = arith.mulf %63, %62 : vector<64x8xf32>
    %cst_39 = arith.constant 1.000000e-01 : f32
    %65 = vector.broadcast %cst_39 : f32 to vector<64x8xf32>
    %66 = arith.mulf %65, %13 : vector<64x8xf32>
    %67 = arith.addf %64, %66 : vector<64x8xf32>
    %cst_40 = arith.constant dense<0.000000e+00> : vector<64x8xf32>
    %68 = tpu.matmul %0, %67, %cst_40 {dimension_numbers = #tpu.dot_dimension_numbers<[1], [0], [0], [1], [0, 0, 1, 1], [], []>} : vector<64x64xf32>, vector<64x8xf32>, vector<64x8xf32> -> vector<64x8xf32>
    %cst_41 = arith.constant 0.899999976 : f32
    %69 = vector.broadcast %cst_41 : f32 to vector<64x8xf32>
    %70 = arith.mulf %69, %68 : vector<64x8xf32>
    %cst_42 = arith.constant 1.000000e-01 : f32
    %71 = vector.broadcast %cst_42 : f32 to vector<64x8xf32>
    %72 = arith.mulf %71, %13 : vector<64x8xf32>
    %73 = arith.addf %70, %72 : vector<64x8xf32>
    %c0_43 = arith.constant 0 : index
    %c0_44 = arith.constant 0 : index
    %74 = vector.load %arg6[%c0_43, %c0_44] : memref<64x8xf32, #tpu.memory_space<vmem>>, vector<64x8xf32>
    tpu.vector_store %arg6[%c0_43, %c0_44], %73 {strides = array<i32>} : memref<64x8xf32, #tpu.memory_space<vmem>>, vector<64x8xf32>,
    return
  }
}

</mosaic_0001>

<bundles_post_ra>
// kernel: appnp_net_forward.1
= control target key start
LH: loop header
LB: loop body
LE: loop exit
PB: predicated region body
PF: predicated region fallthrough
CT: control target
= control target key end

     0   :  { %vm50_vm0 = vcmask 261120   ;;  %vm197_vm1 = vcmask 130048   ;;  %vm327_vm2 = vcmask 523264   ;;  %vm1570_vm3 = vcmask 64512   ;;  %s2606_s2 = inlined_call_operand.vmem [shape: f32[32,16], index: 2, kind: input, shape index: {}]   ;;  %s2607_s1 = inlined_call_operand.vmem [shape: f32[64,32], index: 1, kind: input, shape index: {}]   ;;  %s2608_s4 = inlined_call_operand.vmem [shape: f32[16,8], index: 4, kind: input, shape index: {}]   ;;  %s2609_s3 = inlined_call_operand.vmem [shape: f32[1,16], index: 3, kind: input, shape index: {}]   ;;  %s2610_s0 = inlined_call_operand.vmem [shape: f32[64,64], index: 0, kind: input, shape index: {}]   ;;  %s2611_s5 = inlined_call_operand.vmem [shape: f32[1,8], index: 5, kind: input, shape index: {}]   ;;  %s2612_s6 = inlined_call_operand.vmem [shape: f32[64,8], index: 6, kind: output, shape index: {}]  }
   0x1   :  { %v42_v0 = vld [vmem:[%s2606_s2 + $0x18] sm:$0xff]  ;;  %v41_v1 = vld [vmem:[%s2606_s2 + $0x10] sm:$0xff]  ;;  %v31_v2 = vld [vmem:[%s2607_s1] sm:$0xff] }
   0x2   :  { %1863 = vmatprep.subr.mxu0 %v42_v0  ;;  %v40_v3 = vld [vmem:[%s2606_s2 + $0x8] sm:$0xff]  ;;  %1871 = vmatprep.mubr.msk.f32.mxu0 %vm50_vm0, %v31_v2  ;;  %v39_v4 = vld [vmem:[%s2606_s2] sm:$0xff]  ;;  %v33_v6 = vld [vmem:[%s2607_s1 + $0x10] sm:$0xff] }
   0x3   :  { %1864 = vmatpush3.msra.mxu0 %v42_v0  ;;  %v32_v5 = vld [vmem:[%s2607_s1 + $0x8] sm:$0xff]  ;;  %v34_v7 = vld [vmem:[%s2607_s1 + $0x18] sm:$0xff]  ;;  %v35_v8 = vld [vmem:[%s2607_s1 + $0x20] sm:$0xff] }
   0x4   :  { %1865 = vmatprep.subr.mxu0 %v41_v1  ;;  %v36_v9 = vld [vmem:[%s2607_s1 + $0x28] sm:$0xff]  ;;  %v37_v10 = vld [vmem:[%s2607_s1 + $0x30] sm:$0xff]  ;;  %v38_v11 = vld [vmem:[%s2607_s1 + $0x38] sm:$0xff] }
   0x5   :  { %1866 = vmatpush3.msra.mxu0 %v41_v1  ;;  %v189_v12 = vld [vmem:[%s2608_s4 + $0x8] sm:$0xff]  ;;  %v188_v13 = vld [vmem:[%s2608_s4] sm:$0xff]  ;;  %v2295_v58 = vld [vmem:[%s2610_s0 + $0x10] sm:$0xff] }
   0x6   :  { %1867 = vmatprep.subr.mxu0 %v40_v3  ;;  %1883 = vmatprep.subr.mxu1 %v189_v12  ;;  %v1583_v14 = vld [vmem:[%s2609_s3] ss:$0 sm:$0xff]  ;;  %v2290_v57 = vld [vmem:[%s2610_s0 + $0x8] sm:$0xff]  ;;  %v2304_v59 = vld [vmem:[%s2610_s0 + $0x18] sm:$0xff] }
   0x7   :  { %1868 = vmatpush3.msra.mxu0 %v40_v3  ;;  %1884 = vmatpush3.msra.mxu1 %v189_v12  ;;  %v2278_v39 = vld [vmem:[%s2610_s0] sm:$0xff]  ;;  %v2318_v61 = vld [vmem:[%s2610_s0 + $0x28] sm:$0xff]  ;;  %v2323_v62 = vld [vmem:[%s2610_s0 + $0x30] sm:$0xff] }
   0x8   :  { %1869 = vmatprep.subr.mxu0 %v39_v4  ;;  %1885 = vmatprep.subr.mxu1 %v188_v13  ;;  %v1592_v46 = vld [vmem:[%s2611_s5] ss:$0 sm:$0xff]  ;;  %v2332_v63 = vld [vmem:[%s2610_s0 + $0x38] sm:$0xff] }
   0x9   :  { %1870 = vmatpush3.msra.mxu0 %v39_v4  ;;  %1886 = vmatpush3.msra.mxu1 %v188_v13  ;;  %v2309_v60 = vld [vmem:[%s2610_s0 + $0x20] sm:$0xff] }
   0xa   :  { %1872 = vmatmul.mubr.msk.f32.vlgmr.msra.gmra.mxu0 %vm50_vm0, %v32_v5 }
   0xb   :  { %1874 = vmatprep.mubr.msk.f32.mxu0 %vm50_vm0, %v33_v6 }
   0xe   :  { %1875 = vmatmul.mubr.msk.f32.gmra.mxu0 %vm50_vm0, %v34_v7 }
   0xf   :  { %1877 = vmatprep.mubr.msk.f32.mxu0 %vm50_vm0, %v35_v8 }
  0x12   :  { %1878 = vmatmul.mubr.msk.f32.gmra.mxu0 %vm50_vm0, %v36_v9 }
  0x13   :  { %1880 = vmatprep.mubr.msk.f32.mxu0 %vm50_vm0, %v37_v10 }
  0x16   :  { %1881 = vmatmul.mubr.msk.f32.gmra.mxu0 %vm50_vm0, %v38_v11 }
  0x17   :  { %1943 = vmatprep.mubr.msk.f32.mxu0 %vm327_vm2, %v2278_v39 }
  0xca   :  { %v1873_v15 = vpop.f32.mrf.mxu0 }
  0xcb   :  { %v147_v16 = vadd.f32 %v1873_v15, %v1583_v14 }
  0xcc   :  { %v141_v17 = vpop.f32.mrf.mxu0 }
  0xcd   :  { %v142_v18 = vadd.f32 %v1583_v14, %v141_v17  ;;  %v181_v21 = vmax.f32 %v147_v16, 0.0 }
  0xce   :  { %v1876_v19 = vpop.f32.mrf.mxu0 }
  0xcf   :  { %v180_v20 = vmax.f32 %v142_v18, 0.0  ;;  %v157_v22 = vadd.f32 %v1876_v19, %v1583_v14 }
  0xd0   :  { %v151_v23 = vpop.f32.mrf.mxu0 }
  0xd1   :  { %v152_v24 = vadd.f32 %v1583_v14, %v151_v23  ;;  %1887 = vmatprep.mubr.msk.f32.mxu1 %vm197_vm1, %v180_v20  ;;  %v183_v27 = vmax.f32 %v157_v22, 0.0 }
  0xd2   :  { %v1879_v25 = vpop.f32.mrf.mxu0  ;;  %1888 = vmatmul.mubr.msk.f32.vlgmr.msra.gmra.mxu1 %vm197_vm1, %v181_v21 }
  0xd3   :  { %v182_v26 = vmax.f32 %v152_v24, 0.0  ;;  %v167_v28 = vadd.f32 %v1879_v25, %v1583_v14 }
  0xd4   :  { %v161_v29 = vpop.f32.mrf.mxu0 }
  0xd5   :  { %v162_v30 = vadd.f32 %v1583_v14, %v161_v29  ;;  %1890 = vmatprep.mubr.msk.f32.mxu1 %vm197_vm1, %v182_v26  ;;  %v185_v33 = vmax.f32 %v167_v28, 0.0 }
  0xd6   :  { %v1882_v31 = vpop.f32.mrf.mxu0  ;;  %1891 = vmatmul.mubr.msk.f32.gmra.mxu1 %vm197_vm1, %v183_v27 }
  0xd7   :  { %v184_v32 = vmax.f32 %v162_v30, 0.0  ;;  %v177_v34 = vadd.f32 %v1882_v31, %v1583_v14 }
  0xd8   :  { %v171_v35 = vpop.f32.mrf.mxu0 }
  0xd9   :  { %v172_v36 = vadd.f32 %v1583_v14, %v171_v35  ;;  %1893 = vmatprep.mubr.msk.f32.mxu1 %vm197_vm1, %v184_v32  ;;  %v187_v38 = vmax.f32 %v177_v34, 0.0 }
  0xda   :  { %1894 = vmatmul.mubr.msk.f32.gmra.mxu1 %vm197_vm1, %v185_v33 }
  0xdb   :  { %v186_v37 = vmax.f32 %v172_v36, 0.0 }
  0xdd   :  { %1896 = vmatprep.mubr.msk.f32.mxu1 %vm197_vm1, %v186_v37 }
  0xde   :  { %1897 = vmatmul.mubr.msk.f32.gmra.mxu1 %vm197_vm1, %v187_v38 }
  0xdf   :  { %1915 = vmatprep.mubr.msk.f32.mxu1 %vm327_vm2, %v2278_v39 }
 0x192   :  { %v1889_v40 = vpop.f32.mrf.mxu1 }
 0x193   :  { %v294_v55 = vadd.f32 %v1889_v40, %v1592_v46 }
 0x194   :  { %v288_v41 = vpop.f32.mrf.mxu1 }
 0x195   :  { %v289_v56 = vadd.f32 %v1592_v46, %v288_v41  ;;  %v2355_v26 = vmul.f32 0.1, %v294_v55 }
 0x196   :  { %v1892_v42 = vpop.f32.mrf.mxu1 }
 0x197   :  { %v304_v53 = vadd.f32 %v1892_v42, %v1592_v46  ;;  %v2358_v29 = vmul.f32 0.1, %v289_v56 }
 0x198   :  { %v298_v43 = vpop.f32.mrf.mxu1 }
 0x199   :  { %v299_v54 = vadd.f32 %v1592_v46, %v298_v43  ;;  %v2349_v20 = vmul.f32 0.1, %v304_v53 }
 0x19a   :  { %v1895_v44 = vpop.f32.mrf.mxu1 }
 0x19b   :  { %v314_v51 = vadd.f32 %v1895_v44, %v1592_v46  ;;  %v2352_v23 = vmul.f32 0.1, %v299_v54 }
 0x19c   :  { %v308_v45 = vpop.f32.mrf.mxu1 }
 0x19d   :  { %v309_v52 = vadd.f32 %v1592_v46, %v308_v45  ;;  %v2343_v14 = vmul.f32 0.1, %v314_v51 }
 0x19e   :  { %v1898_v47 = vpop.f32.mrf.mxu1 }
 0x19f   :  { %v324_v48 = vadd.f32 %v1898_v47, %v1592_v46  ;;  %v2346_v17 = vmul.f32 0.1, %v309_v52 }
 0x1a0   :  { %v318_v49 = vpop.f32.mrf.mxu1 }
 0x1a1   :  { %v319_v50 = vadd.f32 %v1592_v46, %v318_v49  ;;  %1899 = vmatprep.subr.mxu1 %v324_v48  ;;  %v2338_v7 = vmul.f32 0.1, %v324_v48 }
 0x1a2   :  { %1900 = vmatpush3.msra.mxu1 %v324_v48 }
 0x1a3   :  { %1901 = vmatprep.subr.mxu1 %v319_v50  ;;  %v2340_v10 = vmul.f32 0.1, %v319_v50 }
 0x1a4   :  { %1902 = vmatpush3.msra.mxu1 %v319_v50 }
 0x1a5   :  { %1903 = vmatprep.subr.mxu1 %v314_v51 }
 0x1a6   :  { %1904 = vmatpush3.msra.mxu1 %v314_v51 }
 0x1a7   :  { %1905 = vmatprep.subr.mxu1 %v309_v52 }
 0x1a8   :  { %1906 = vmatpush3.msra.mxu1 %v309_v52 }
 0x1a9   :  { %1907 = vmatprep.subr.mxu1 %v304_v53 }
 0x1aa   :  { %1908 = vmatpush3.msra.mxu1 %v304_v53 }
 0x1ab   :  { %1909 = vmatprep.subr.mxu1 %v299_v54 }
 0x1ac   :  { %1910 = vmatpush3.msra.mxu1 %v299_v54 }
 0x1ad   :  { %1911 = vmatprep.subr.mxu1 %v294_v55 }
 0x1ae   :  { %1912 = vmatpush3.msra.mxu1 %v294_v55 }
 0x1af   :  { %1913 = vmatprep.subr.mxu1 %v289_v56 }
 0x1b0   :  { %1914 = vmatpush3.msra.mxu1 %v289_v56 }
 0x1b1   :  { %1916 = vmatmul.mubr.msk.f32.vlgmr.msra.gmra.mxu1 %vm327_vm2, %v2290_v57 }
 0x1b2   :  { %1918 = vmatprep.mubr.msk.f32.mxu1 %vm327_vm2, %v2295_v58 }
 0x1b5   :  { %1919 = vmatmul.mubr.msk.f32.gmra.mxu1 %vm327_vm2, %v2304_v59 }
 0x1b6   :  { %1921 = vmatprep.mubr.msk.f32.mxu1 %vm327_vm2, %v2309_v60 }
 0x1b9   :  { %1922 = vmatmul.mubr.msk.f32.gmra.mxu1 %vm327_vm2, %v2318_v61 }
 0x1ba   :  { %1924 = vmatprep.mubr.msk.f32.mxu1 %vm327_vm2, %v2323_v62 }
 0x1bd   :  { %1925 = vmatmul.mubr.msk.f32.gmra.mxu1 %vm327_vm2, %v2332_v63 }
 0x1be   :  { %1971 = vmatprep.mubr.msk.f32.mxu1 %vm327_vm2, %v2278_v39 }
 0x271   :  { %v1917_v0 = vpop.f32.mrf.mxu1 }
 0x272   :  { %v458_v24 = vmul.f32 0.9, %v1917_v0 }
 0x273   :  { %v418_v1 = vpop.f32.mrf.mxu1 }
 0x274   :  { %v457_v27 = vmul.f32 0.9, %v418_v1  ;;  %v474_v30 = vadd.f32 %v2355_v26, %v458_v24 }
 0x275   :  { %v1920_v2 = vpop.f32.mrf.mxu1 }
 0x276   :  { %v460_v18 = vmul.f32 0.9, %v1920_v2  ;;  %v473_v31 = vadd.f32 %v2358_v29, %v457_v27 }
 0x277   :  { %v428_v3 = vpop.f32.mrf.mxu1 }
 0x278   :  { %v459_v21 = vmul.f32 0.9, %v428_v3  ;;  %v476_v25 = vadd.f32 %v2349_v20, %v460_v18 }
 0x279   :  { %v1923_v4 = vpop.f32.mrf.mxu1 }
 0x27a   :  { %v462_v11 = vmul.f32 0.9, %v1923_v4  ;;  %v475_v28 = vadd.f32 %v2352_v23, %v459_v21 }
 0x27b   :  { %v438_v5 = vpop.f32.mrf.mxu1 }
 0x27c   :  { %v461_v15 = vmul.f32 0.9, %v438_v5  ;;  %v478_v19 = vadd.f32 %v2343_v14, %v462_v11 }
 0x27d   :  { %v1926_v6 = vpop.f32.mrf.mxu1 }
 0x27e   :  { %v464_v8 = vmul.f32 0.9, %v1926_v6  ;;  %v477_v22 = vadd.f32 %v2346_v17, %v461_v15 }
 0x27f   :  { %v448_v9 = vpop.f32.mrf.mxu1 }
 0x280   :  { %v480_v12 = vadd.f32 %v2338_v7, %v464_v8  ;;  %v463_v13 = vmul.f32 0.9, %v448_v9 }
 0x282   :  { %v479_v16 = vadd.f32 %v2340_v10, %v463_v13  ;;  %1927 = vmatprep.subr.mxu0 %v480_v12 }
 0x283   :  { %1928 = vmatpush3.msra.mxu0 %v480_v12 }
 0x284   :  { %1929 = vmatprep.subr.mxu0 %v479_v16 }
 0x285   :  { %1930 = vmatpush3.msra.mxu0 %v479_v16 }
 0x286   :  { %1931 = vmatprep.subr.mxu0 %v478_v19 }
 0x287   :  { %1932 = vmatpush3.msra.mxu0 %v478_v19 }
 0x288   :  { %1933 = vmatprep.subr.mxu0 %v477_v22 }
 0x289   :  { %1934 = vmatpush3.msra.mxu0 %v477_v22 }
 0x28a   :  { %1935 = vmatprep.subr.mxu0 %v476_v25 }
 0x28b   :  { %1936 = vmatpush3.msra.mxu0 %v476_v25 }
 0x28c   :  { %1937 = vmatprep.subr.mxu0 %v475_v28 }
 0x28d   :  { %1938 = vmatpush3.msra.mxu0 %v475_v28 }
 0x28e   :  { %1939 = vmatprep.subr.mxu0 %v474_v30 }
 0x28f   :  { %1940 = vmatpush3.msra.mxu0 %v474_v30 }
 0x290   :  { %1941 = vmatprep.subr.mxu0 %v473_v31 }
 0x291   :  { %1942 = vmatpush3.msra.mxu0 %v473_v31 }
 0x292   :  { %1944 = vmatmul.mubr.msk.f32.vlgmr.msra.gmra.mxu0 %vm327_vm2, %v2290_v57 }
 0x293   :  { %1946 = vmatprep.mubr.msk.f32.mxu0 %vm327_vm2, %v2295_v58 }
 0x296   :  { %1947 = vmatmul.mubr.msk.f32.gmra.mxu0 %vm327_vm2, %v2304_v59 }
 0x297   :  { %1949 = vmatprep.mubr.msk.f32.mxu0 %vm327_vm2, %v2309_v60 }
 0x29a   :  { %1950 = vmatmul.mubr.msk.f32.gmra.mxu0 %vm327_vm2, %v2318_v61 }
 0x29b   :  { %1952 = vmatprep.mubr.msk.f32.mxu0 %vm327_vm2, %v2323_v62 }
 0x29e   :  { %1953 = vmatmul.mubr.msk.f32.gmra.mxu0 %vm327_vm2, %v2332_v63 }
 0x29f   :  { %1999 = vmatprep.mubr.msk.f32.mxu0 %vm327_vm2, %v2278_v39 }
 0x352   :  { %v1945_v32 = vpop.f32.mrf.mxu0 }
 0x353   :  { %v587_v51 = vmul.f32 0.9, %v1945_v32 }
 0x354   :  { %v547_v33 = vpop.f32.mrf.mxu0 }
 0x355   :  { %v586_v53 = vmul.f32 0.9, %v547_v33  ;;  %v595_v55 = vadd.f32 %v587_v51, %v2355_v26 }
 0x356   :  { %v1948_v34 = vpop.f32.mrf.mxu0 }
 0x357   :  { %v589_v47 = vmul.f32 0.9, %v1948_v34  ;;  %v594_v56 = vadd.f32 %v586_v53, %v2358_v29 }
 0x358   :  { %v557_v35 = vpop.f32.mrf.mxu0 }
 0x359   :  { %v588_v49 = vmul.f32 0.9, %v557_v35  ;;  %v597_v52 = vadd.f32 %v589_v47, %v2349_v20 }
 0x35a   :  { %v1951_v36 = vpop.f32.mrf.mxu0 }
 0x35b   :  { %v591_v42 = vmul.f32 0.9, %v1951_v36  ;;  %v596_v54 = vadd.f32 %v588_v49, %v2352_v23 }
 0x35c   :  { %v567_v37 = vpop.f32.mrf.mxu0 }
 0x35d   :  { %v590_v45 = vmul.f32 0.9, %v567_v37  ;;  %v599_v48 = vadd.f32 %v591_v42, %v2343_v14 }
 0x35e   :  { %v1954_v38 = vpop.f32.mrf.mxu0 }
 0x35f   :  { %v593_v40 = vmul.f32 0.9, %v1954_v38  ;;  %v598_v50 = vadd.f32 %v590_v45, %v2346_v17 }
 0x360   :  { %v577_v41 = vpop.f32.mrf.mxu0 }
 0x361   :  { %v601_v43 = vadd.f32 %v593_v40, %v2338_v7  ;;  %v592_v44 = vmul.f32 0.9, %v577_v41 }
 0x363   :  { %v600_v46 = vadd.f32 %v592_v44, %v2340_v10  ;;  %1955 = vmatprep.subr.mxu1 %v601_v43 }
 0x364   :  { %1956 = vmatpush3.msra.mxu1 %v601_v43 }
 0x365   :  { %1957 = vmatprep.subr.mxu1 %v600_v46 }
 0x366   :  { %1958 = vmatpush3.msra.mxu1 %v600_v46 }
 0x367   :  { %1959 = vmatprep.subr.mxu1 %v599_v48 }
 0x368   :  { %1960 = vmatpush3.msra.mxu1 %v599_v48 }
 0x369   :  { %1961 = vmatprep.subr.mxu1 %v598_v50 }
 0x36a   :  { %1962 = vmatpush3.msra.mxu1 %v598_v50 }
 0x36b   :  { %1963 = vmatprep.subr.mxu1 %v597_v52 }
 0x36c   :  { %1964 = vmatpush3.msra.mxu1 %v597_v52 }
 0x36d   :  { %1965 = vmatprep.subr.mxu1 %v596_v54 }
 0x36e   :  { %1966 = vmatpush3.msra.mxu1 %v596_v54 }
 0x36f   :  { %1967 = vmatprep.subr.mxu1 %v595_v55 }
 0x370   :  { %1968 = vmatpush3.msra.mxu1 %v595_v55 }
 0x371   :  { %1969 = vmatprep.subr.mxu1 %v594_v56 }
 0x372   :  { %1970 = vmatpush3.msra.mxu1 %v594_v56 }
 0x373   :  { %1972 = vmatmul.mubr.msk.f32.vlgmr.msra.gmra.mxu1 %vm327_vm2, %v2290_v57 }
 0x374   :  { %1974 = vmatprep.mubr.msk.f32.mxu1 %vm327_vm2, %v2295_v58 }
 0x377   :  { %1975 = vmatmul.mubr.msk.f32.gmra.mxu1 %vm327_vm2, %v2304_v59 }
 0x378   :  { %1977 = vmatprep.mubr.msk.f32.mxu1 %vm327_vm2, %v2309_v60 }
 0x37b   :  { %1978 = vmatmul.mubr.msk.f32.gmra.mxu1 %vm327_vm2, %v2318_v61 }
 0x37c   :  { %1980 = vmatprep.mubr.msk.f32.mxu1 %vm327_vm2, %v2323_v62 }
 0x37f   :  { %1981 = vmatmul.mubr.msk.f32.gmra.mxu1 %vm327_vm2, %v2332_v63 }
 0x380   :  { %2027 = vmatprep.mubr.msk.f32.mxu1 %vm327_vm2, %v2278_v39 }
 0x433   :  { %v1973_v0 = vpop.f32.mrf.mxu1 }
 0x434   :  { %v708_v24 = vmul.f32 0.9, %v1973_v0 }
 0x435   :  { %v668_v1 = vpop.f32.mrf.mxu1 }
 0x436   :  { %v707_v27 = vmul.f32 0.9, %v668_v1  ;;  %v716_v30 = vadd.f32 %v708_v24, %v2355_v26 }
 0x437   :  { %v1976_v2 = vpop.f32.mrf.mxu1 }
 0x438   :  { %v710_v18 = vmul.f32 0.9, %v1976_v2  ;;  %v715_v31 = vadd.f32 %v707_v27, %v2358_v29 }
 0x439   :  { %v678_v3 = vpop.f32.mrf.mxu1 }
 0x43a   :  { %v709_v21 = vmul.f32 0.9, %v678_v3  ;;  %v718_v25 = vadd.f32 %v710_v18, %v2349_v20 }
 0x43b   :  { %v1979_v4 = vpop.f32.mrf.mxu1 }
 0x43c   :  { %v712_v11 = vmul.f32 0.9, %v1979_v4  ;;  %v717_v28 = vadd.f32 %v709_v21, %v2352_v23 }
 0x43d   :  { %v688_v5 = vpop.f32.mrf.mxu1 }
 0x43e   :  { %v711_v15 = vmul.f32 0.9, %v688_v5  ;;  %v720_v19 = vadd.f32 %v712_v11, %v2343_v14 }
 0x43f   :  { %v1982_v6 = vpop.f32.mrf.mxu1 }
 0x440   :  { %v714_v8 = vmul.f32 0.9, %v1982_v6  ;;  %v719_v22 = vadd.f32 %v711_v15, %v2346_v17 }
 0x441   :  { %v698_v9 = vpop.f32.mrf.mxu1 }
 0x442   :  { %v722_v12 = vadd.f32 %v714_v8, %v2338_v7  ;;  %v713_v13 = vmul.f32 0.9, %v698_v9 }
 0x444   :  { %v721_v16 = vadd.f32 %v713_v13, %v2340_v10  ;;  %1983 = vmatprep.subr.mxu0 %v722_v12 }
 0x445   :  { %1984 = vmatpush3.msra.mxu0 %v722_v12 }
 0x446   :  { %1985 = vmatprep.subr.mxu0 %v721_v16 }
 0x447   :  { %1986 = vmatpush3.msra.mxu0 %v721_v16 }
 0x448   :  { %1987 = vmatprep.subr.mxu0 %v720_v19 }
 0x449   :  { %1988 = vmatpush3.msra.mxu0 %v720_v19 }
 0x44a   :  { %1989 = vmatprep.subr.mxu0 %v719_v22 }
 0x44b   :  { %1990 = vmatpush3.msra.mxu0 %v719_v22 }
 0x44c   :  { %1991 = vmatprep.subr.mxu0 %v718_v25 }
 0x44d   :  { %1992 = vmatpush3.msra.mxu0 %v718_v25 }
 0x44e   :  { %1993 = vmatprep.subr.mxu0 %v717_v28 }
 0x44f   :  { %1994 = vmatpush3.msra.mxu0 %v717_v28 }
 0x450   :  { %1995 = vmatprep.subr.mxu0 %v716_v30 }
 0x451   :  { %1996 = vmatpush3.msra.mxu0 %v716_v30 }
 0x452   :  { %1997 = vmatprep.subr.mxu0 %v715_v31 }
 0x453   :  { %1998 = vmatpush3.msra.mxu0 %v715_v31 }
 0x454   :  { %2000 = vmatmul.mubr.msk.f32.vlgmr.msra.gmra.mxu0 %vm327_vm2, %v2290_v57 }
 0x455   :  { %2002 = vmatprep.mubr.msk.f32.mxu0 %vm327_vm2, %v2295_v58 }
 0x458   :  { %2003 = vmatmul.mubr.msk.f32.gmra.mxu0 %vm327_vm2, %v2304_v59 }
 0x459   :  { %2005 = vmatprep.mubr.msk.f32.mxu0 %vm327_vm2, %v2309_v60 }
 0x45c   :  { %2006 = vmatmul.mubr.msk.f32.gmra.mxu0 %vm327_vm2, %v2318_v61 }
 0x45d   :  { %2008 = vmatprep.mubr.msk.f32.mxu0 %vm327_vm2, %v2323_v62 }
 0x460   :  { %2009 = vmatmul.mubr.msk.f32.gmra.mxu0 %vm327_vm2, %v2332_v63 }
 0x461   :  { %2055 = vmatprep.mubr.msk.f32.mxu0 %vm327_vm2, %v2278_v39 }
 0x514   :  { %v2001_v32 = vpop.f32.mrf.mxu0 }
 0x515   :  { %v829_v51 = vmul.f32 0.9, %v2001_v32 }
 0x516   :  { %v789_v33 = vpop.f32.mrf.mxu0 }
 0x517   :  { %v828_v53 = vmul.f32 0.9, %v789_v33  ;;  %v837_v55 = vadd.f32 %v829_v51, %v2355_v26 }
 0x518   :  { %v2004_v34 = vpop.f32.mrf.mxu0 }
 0x519   :  { %v831_v47 = vmul.f32 0.9, %v2004_v34  ;;  %v836_v56 = vadd.f32 %v828_v53, %v2358_v29 }
 0x51a   :  { %v799_v35 = vpop.f32.mrf.mxu0 }
 0x51b   :  { %v830_v49 = vmul.f32 0.9, %v799_v35  ;;  %v839_v52 = vadd.f32 %v831_v47, %v2349_v20 }
 0x51c   :  { %v2007_v36 = vpop.f32.mrf.mxu0 }
 0x51d   :  { %v833_v42 = vmul.f32 0.9, %v2007_v36  ;;  %v838_v54 = vadd.f32 %v830_v49, %v2352_v23 }
 0x51e   :  { %v809_v37 = vpop.f32.mrf.mxu0 }
 0x51f   :  { %v832_v45 = vmul.f32 0.9, %v809_v37  ;;  %v841_v48 = vadd.f32 %v833_v42, %v2343_v14 }
 0x520   :  { %v2010_v38 = vpop.f32.mrf.mxu0 }
 0x521   :  { %v835_v40 = vmul.f32 0.9, %v2010_v38  ;;  %v840_v50 = vadd.f32 %v832_v45, %v2346_v17 }
 0x522   :  { %v819_v41 = vpop.f32.mrf.mxu0 }
 0x523   :  { %v843_v43 = vadd.f32 %v835_v40, %v2338_v7  ;;  %v834_v44 = vmul.f32 0.9, %v819_v41 }
 0x525   :  { %v842_v46 = vadd.f32 %v834_v44, %v2340_v10  ;;  %2011 = vmatprep.subr.mxu1 %v843_v43 }
 0x526   :  { %2012 = vmatpush3.msra.mxu1 %v843_v43 }
 0x527   :  { %2013 = vmatprep.subr.mxu1 %v842_v46 }
 0x528   :  { %2014 = vmatpush3.msra.mxu1 %v842_v46 }
 0x529   :  { %2015 = vmatprep.subr.mxu1 %v841_v48 }
 0x52a   :  { %2016 = vmatpush3.msra.mxu1 %v841_v48 }
 0x52b   :  { %2017 = vmatprep.subr.mxu1 %v840_v50 }
 0x52c   :  { %2018 = vmatpush3.msra.mxu1 %v840_v50 }
 0x52d   :  { %2019 = vmatprep.subr.mxu1 %v839_v52 }
 0x52e   :  { %2020 = vmatpush3.msra.mxu1 %v839_v52 }
 0x52f   :  { %2021 = vmatprep.subr.mxu1 %v838_v54 }
 0x530   :  { %2022 = vmatpush3.msra.mxu1 %v838_v54 }
 0x531   :  { %2023 = vmatprep.subr.mxu1 %v837_v55 }
 0x532   :  { %2024 = vmatpush3.msra.mxu1 %v837_v55 }
 0x533   :  { %2025 = vmatprep.subr.mxu1 %v836_v56 }
 0x534   :  { %2026 = vmatpush3.msra.mxu1 %v836_v56 }
 0x535   :  { %2028 = vmatmul.mubr.msk.f32.vlgmr.msra.gmra.mxu1 %vm327_vm2, %v2290_v57 }
 0x536   :  { %2030 = vmatprep.mubr.msk.f32.mxu1 %vm327_vm2, %v2295_v58 }
 0x539   :  { %2031 = vmatmul.mubr.msk.f32.gmra.mxu1 %vm327_vm2, %v2304_v59 }
 0x53a   :  { %2033 = vmatprep.mubr.msk.f32.mxu1 %vm327_vm2, %v2309_v60 }
 0x53d   :  { %2034 = vmatmul.mubr.msk.f32.gmra.mxu1 %vm327_vm2, %v2318_v61 }
 0x53e   :  { %2036 = vmatprep.mubr.msk.f32.mxu1 %vm327_vm2, %v2323_v62 }
 0x541   :  { %2037 = vmatmul.mubr.msk.f32.gmra.mxu1 %vm327_vm2, %v2332_v63 }
 0x542   :  { %2083 = vmatprep.mubr.msk.f32.mxu1 %vm327_vm2, %v2278_v39 }
 0x5f5   :  { %v2029_v0 = vpop.f32.mrf.mxu1 }
 0x5f6   :  { %v950_v24 = vmul.f32 0.9, %v2029_v0 }
 0x5f7   :  { %v910_v1 = vpop.f32.mrf.mxu1 }
 0x5f8   :  { %v949_v27 = vmul.f32 0.9, %v910_v1  ;;  %v958_v30 = vadd.f32 %v950_v24, %v2355_v26 }
 0x5f9   :  { %v2032_v2 = vpop.f32.mrf.mxu1 }
 0x5fa   :  { %v952_v18 = vmul.f32 0.9, %v2032_v2  ;;  %v957_v31 = vadd.f32 %v949_v27, %v2358_v29 }
 0x5fb   :  { %v920_v3 = vpop.f32.mrf.mxu1 }
 0x5fc   :  { %v951_v21 = vmul.f32 0.9, %v920_v3  ;;  %v960_v25 = vadd.f32 %v952_v18, %v2349_v20 }
 0x5fd   :  { %v2035_v4 = vpop.f32.mrf.mxu1 }
 0x5fe   :  { %v954_v11 = vmul.f32 0.9, %v2035_v4  ;;  %v959_v28 = vadd.f32 %v951_v21, %v2352_v23 }
 0x5ff   :  { %v930_v5 = vpop.f32.mrf.mxu1 }
 0x600   :  { %v953_v15 = vmul.f32 0.9, %v930_v5  ;;  %v962_v19 = vadd.f32 %v954_v11, %v2343_v14 }
 0x601   :  { %v2038_v6 = vpop.f32.mrf.mxu1 }
 0x602   :  { %v956_v8 = vmul.f32 0.9, %v2038_v6  ;;  %v961_v22 = vadd.f32 %v953_v15, %v2346_v17 }
 0x603   :  { %v940_v9 = vpop.f32.mrf.mxu1 }
 0x604   :  { %v964_v12 = vadd.f32 %v956_v8, %v2338_v7  ;;  %v955_v13 = vmul.f32 0.9, %v940_v9 }
 0x606   :  { %v963_v16 = vadd.f32 %v955_v13, %v2340_v10  ;;  %2039 = vmatprep.subr.mxu0 %v964_v12 }
 0x607   :  { %2040 = vmatpush3.msra.mxu0 %v964_v12 }
 0x608   :  { %2041 = vmatprep.subr.mxu0 %v963_v16 }
 0x609   :  { %2042 = vmatpush3.msra.mxu0 %v963_v16 }
 0x60a   :  { %2043 = vmatprep.subr.mxu0 %v962_v19 }
 0x60b   :  { %2044 = vmatpush3.msra.mxu0 %v962_v19 }
 0x60c   :  { %2045 = vmatprep.subr.mxu0 %v961_v22 }
 0x60d   :  { %2046 = vmatpush3.msra.mxu0 %v961_v22 }
 0x60e   :  { %2047 = vmatprep.subr.mxu0 %v960_v25 }
 0x60f   :  { %2048 = vmatpush3.msra.mxu0 %v960_v25 }
 0x610   :  { %2049 = vmatprep.subr.mxu0 %v959_v28 }
 0x611   :  { %2050 = vmatpush3.msra.mxu0 %v959_v28 }
 0x612   :  { %2051 = vmatprep.subr.mxu0 %v958_v30 }
 0x613   :  { %2052 = vmatpush3.msra.mxu0 %v958_v30 }
 0x614   :  { %2053 = vmatprep.subr.mxu0 %v957_v31 }
 0x615   :  { %2054 = vmatpush3.msra.mxu0 %v957_v31 }
 0x616   :  { %2056 = vmatmul.mubr.msk.f32.vlgmr.msra.gmra.mxu0 %vm327_vm2, %v2290_v57 }
 0x617   :  { %2058 = vmatprep.mubr.msk.f32.mxu0 %vm327_vm2, %v2295_v58 }
 0x61a   :  { %2059 = vmatmul.mubr.msk.f32.gmra.mxu0 %vm327_vm2, %v2304_v59 }
 0x61b   :  { %2061 = vmatprep.mubr.msk.f32.mxu0 %vm327_vm2, %v2309_v60 }
 0x61e   :  { %2062 = vmatmul.mubr.msk.f32.gmra.mxu0 %vm327_vm2, %v2318_v61 }
 0x61f   :  { %2064 = vmatprep.mubr.msk.f32.mxu0 %vm327_vm2, %v2323_v62 }
 0x622   :  { %2065 = vmatmul.mubr.msk.f32.gmra.mxu0 %vm327_vm2, %v2332_v63 }
 0x623   :  { %2111 = vmatprep.mubr.msk.f32.mxu0 %vm327_vm2, %v2278_v39 }
 0x6d6   :  { %v2057_v32 = vpop.f32.mrf.mxu0 }
 0x6d7   :  { %v1071_v51 = vmul.f32 0.9, %v2057_v32 }
 0x6d8   :  { %v1031_v33 = vpop.f32.mrf.mxu0 }
 0x6d9   :  { %v1070_v53 = vmul.f32 0.9, %v1031_v33  ;;  %v1079_v55 = vadd.f32 %v1071_v51, %v2355_v26 }
 0x6da   :  { %v2060_v34 = vpop.f32.mrf.mxu0 }
 0x6db   :  { %v1073_v47 = vmul.f32 0.9, %v2060_v34  ;;  %v1078_v56 = vadd.f32 %v1070_v53, %v2358_v29 }
 0x6dc   :  { %v1041_v35 = vpop.f32.mrf.mxu0 }
 0x6dd   :  { %v1072_v49 = vmul.f32 0.9, %v1041_v35  ;;  %v1081_v52 = vadd.f32 %v1073_v47, %v2349_v20 }
 0x6de   :  { %v2063_v36 = vpop.f32.mrf.mxu0 }
 0x6df   :  { %v1075_v42 = vmul.f32 0.9, %v2063_v36  ;;  %v1080_v54 = vadd.f32 %v1072_v49, %v2352_v23 }
 0x6e0   :  { %v1051_v37 = vpop.f32.mrf.mxu0 }
 0x6e1   :  { %v1074_v45 = vmul.f32 0.9, %v1051_v37  ;;  %v1083_v48 = vadd.f32 %v1075_v42, %v2343_v14 }
 0x6e2   :  { %v2066_v38 = vpop.f32.mrf.mxu0 }
 0x6e3   :  { %v1077_v40 = vmul.f32 0.9, %v2066_v38  ;;  %v1082_v50 = vadd.f32 %v1074_v45, %v2346_v17 }
 0x6e4   :  { %v1061_v41 = vpop.f32.mrf.mxu0 }
 0x6e5   :  { %v1085_v43 = vadd.f32 %v1077_v40, %v2338_v7  ;;  %v1076_v44 = vmul.f32 0.9, %v1061_v41 }
 0x6e7   :  { %v1084_v46 = vadd.f32 %v1076_v44, %v2340_v10  ;;  %2067 = vmatprep.subr.mxu1 %v1085_v43 }
 0x6e8   :  { %2068 = vmatpush3.msra.mxu1 %v1085_v43 }
 0x6e9   :  { %2069 = vmatprep.subr.mxu1 %v1084_v46 }
 0x6ea   :  { %2070 = vmatpush3.msra.mxu1 %v1084_v46 }
 0x6eb   :  { %2071 = vmatprep.subr.mxu1 %v1083_v48 }
 0x6ec   :  { %2072 = vmatpush3.msra.mxu1 %v1083_v48 }
 0x6ed   :  { %2073 = vmatprep.subr.mxu1 %v1082_v50 }
 0x6ee   :  { %2074 = vmatpush3.msra.mxu1 %v1082_v50 }
 0x6ef   :  { %2075 = vmatprep.subr.mxu1 %v1081_v52 }
 0x6f0   :  { %2076 = vmatpush3.msra.mxu1 %v1081_v52 }
 0x6f1   :  { %2077 = vmatprep.subr.mxu1 %v1080_v54 }
 0x6f2   :  { %2078 = vmatpush3.msra.mxu1 %v1080_v54 }
 0x6f3   :  { %2079 = vmatprep.subr.mxu1 %v1079_v55 }
 0x6f4   :  { %2080 = vmatpush3.msra.mxu1 %v1079_v55 }
 0x6f5   :  { %2081 = vmatprep.subr.mxu1 %v1078_v56 }
 0x6f6   :  { %2082 = vmatpush3.msra.mxu1 %v1078_v56 }
 0x6f7   :  { %2084 = vmatmul.mubr.msk.f32.vlgmr.msra.gmra.mxu1 %vm327_vm2, %v2290_v57 }
 0x6f8   :  { %2086 = vmatprep.mubr.msk.f32.mxu1 %vm327_vm2, %v2295_v58 }
 0x6fb   :  { %2087 = vmatmul.mubr.msk.f32.gmra.mxu1 %vm327_vm2, %v2304_v59 }
 0x6fc   :  { %2089 = vmatprep.mubr.msk.f32.mxu1 %vm327_vm2, %v2309_v60 }
 0x6ff   :  { %2090 = vmatmul.mubr.msk.f32.gmra.mxu1 %vm327_vm2, %v2318_v61 }
 0x700   :  { %2092 = vmatprep.mubr.msk.f32.mxu1 %vm327_vm2, %v2323_v62 }
 0x703   :  { %2093 = vmatmul.mubr.msk.f32.gmra.mxu1 %vm327_vm2, %v2332_v63 }
 0x704   :  { %2139 = vmatprep.mubr.msk.f32.mxu1 %vm327_vm2, %v2278_v39 }
 0x7b7   :  { %v2085_v0 = vpop.f32.mrf.mxu1 }
 0x7b8   :  { %v1192_v24 = vmul.f32 0.9, %v2085_v0 }
 0x7b9   :  { %v1152_v1 = vpop.f32.mrf.mxu1 }
 0x7ba   :  { %v1191_v27 = vmul.f32 0.9, %v1152_v1  ;;  %v1200_v30 = vadd.f32 %v1192_v24, %v2355_v26 }
 0x7bb   :  { %v2088_v2 = vpop.f32.mrf.mxu1 }
 0x7bc   :  { %v1194_v18 = vmul.f32 0.9, %v2088_v2  ;;  %v1199_v31 = vadd.f32 %v1191_v27, %v2358_v29 }
 0x7bd   :  { %v1162_v3 = vpop.f32.mrf.mxu1 }
 0x7be   :  { %v1193_v21 = vmul.f32 0.9, %v1162_v3  ;;  %v1202_v25 = vadd.f32 %v1194_v18, %v2349_v20 }
 0x7bf   :  { %v2091_v4 = vpop.f32.mrf.mxu1 }
 0x7c0   :  { %v1196_v11 = vmul.f32 0.9, %v2091_v4  ;;  %v1201_v28 = vadd.f32 %v1193_v21, %v2352_v23 }
 0x7c1   :  { %v1172_v5 = vpop.f32.mrf.mxu1 }
 0x7c2   :  { %v1195_v15 = vmul.f32 0.9, %v1172_v5  ;;  %v1204_v19 = vadd.f32 %v1196_v11, %v2343_v14 }
 0x7c3   :  { %v2094_v6 = vpop.f32.mrf.mxu1 }
 0x7c4   :  { %v1198_v8 = vmul.f32 0.9, %v2094_v6  ;;  %v1203_v22 = vadd.f32 %v1195_v15, %v2346_v17 }
 0x7c5   :  { %v1182_v9 = vpop.f32.mrf.mxu1 }
 0x7c6   :  { %v1206_v12 = vadd.f32 %v1198_v8, %v2338_v7  ;;  %v1197_v13 = vmul.f32 0.9, %v1182_v9 }
 0x7c8   :  { %v1205_v16 = vadd.f32 %v1197_v13, %v2340_v10  ;;  %2095 = vmatprep.subr.mxu0 %v1206_v12 }
 0x7c9   :  { %2096 = vmatpush3.msra.mxu0 %v1206_v12 }
 0x7ca   :  { %2097 = vmatprep.subr.mxu0 %v1205_v16 }
 0x7cb   :  { %2098 = vmatpush3.msra.mxu0 %v1205_v16 }
 0x7cc   :  { %2099 = vmatprep.subr.mxu0 %v1204_v19 }
 0x7cd   :  { %2100 = vmatpush3.msra.mxu0 %v1204_v19 }
 0x7ce   :  { %2101 = vmatprep.subr.mxu0 %v1203_v22 }
 0x7cf   :  { %2102 = vmatpush3.msra.mxu0 %v1203_v22 }
 0x7d0   :  { %2103 = vmatprep.subr.mxu0 %v1202_v25 }
 0x7d1   :  { %2104 = vmatpush3.msra.mxu0 %v1202_v25 }
 0x7d2   :  { %2105 = vmatprep.subr.mxu0 %v1201_v28 }
 0x7d3   :  { %2106 = vmatpush3.msra.mxu0 %v1201_v28 }
 0x7d4   :  { %2107 = vmatprep.subr.mxu0 %v1200_v30 }
 0x7d5   :  { %2108 = vmatpush3.msra.mxu0 %v1200_v30 }
 0x7d6   :  { %2109 = vmatprep.subr.mxu0 %v1199_v31 }
 0x7d7   :  { %2110 = vmatpush3.msra.mxu0 %v1199_v31 }
 0x7d8   :  { %2112 = vmatmul.mubr.msk.f32.vlgmr.msra.gmra.mxu0 %vm327_vm2, %v2290_v57 }
 0x7d9   :  { %2114 = vmatprep.mubr.msk.f32.mxu0 %vm327_vm2, %v2295_v58 }
 0x7dc   :  { %2115 = vmatmul.mubr.msk.f32.gmra.mxu0 %vm327_vm2, %v2304_v59 }
 0x7dd   :  { %2117 = vmatprep.mubr.msk.f32.mxu0 %vm327_vm2, %v2309_v60 }
 0x7e0   :  { %2118 = vmatmul.mubr.msk.f32.gmra.mxu0 %vm327_vm2, %v2318_v61 }
 0x7e1   :  { %2120 = vmatprep.mubr.msk.f32.mxu0 %vm327_vm2, %v2323_v62 }
 0x7e4   :  { %2121 = vmatmul.mubr.msk.f32.gmra.mxu0 %vm327_vm2, %v2332_v63 }
 0x7e5   :  { %2167 = vmatprep.mubr.msk.f32.mxu0 %vm327_vm2, %v2278_v39 }
 0x898   :  { %v2113_v32 = vpop.f32.mrf.mxu0 }
 0x899   :  { %v1313_v50 = vmul.f32 0.9, %v2113_v32 }
 0x89a   :  { %v1273_v33 = vpop.f32.mrf.mxu0 }
 0x89b   :  { %v1312_v52 = vmul.f32 0.9, %v1273_v33  ;;  %v1321_v54 = vadd.f32 %v1313_v50, %v2355_v26 }
 0x89c   :  { %v2116_v34 = vpop.f32.mrf.mxu0 }
 0x89d   :  { %v1315_v47 = vmul.f32 0.9, %v2116_v34  ;;  %v1320_v55 = vadd.f32 %v1312_v52, %v2358_v29 }
 0x89e   :  { %v1283_v35 = vpop.f32.mrf.mxu0 }
 0x89f   :  { %v1314_v48 = vmul.f32 0.9, %v1283_v35  ;;  %v1323_v51 = vadd.f32 %v1315_v47, %v2349_v20 }
 0x8a0   :  { %v2119_v36 = vpop.f32.mrf.mxu0 }
 0x8a1   :  { %v1317_v42 = vmul.f32 0.9, %v2119_v36  ;;  %v1322_v53 = vadd.f32 %v1314_v48, %v2352_v23 }
 0x8a2   :  { %v1293_v37 = vpop.f32.mrf.mxu0 }
 0x8a3   :  { %v1316_v45 = vmul.f32 0.9, %v1293_v37  ;;  %v1325_v39 = vadd.f32 %v1317_v42, %v2343_v14 }
 0x8a4   :  { %v2122_v38 = vpop.f32.mrf.mxu0 }
 0x8a5   :  { %v1319_v40 = vmul.f32 0.9, %v2122_v38  ;;  %v1324_v49 = vadd.f32 %v1316_v45, %v2346_v17 }
 0x8a6   :  { %v1303_v41 = vpop.f32.mrf.mxu0 }
 0x8a7   :  { %v1327_v43 = vadd.f32 %v1319_v40, %v2338_v7  ;;  %v1318_v44 = vmul.f32 0.9, %v1303_v41 }
 0x8a9   :  { %v1326_v46 = vadd.f32 %v1318_v44, %v2340_v10  ;;  %2123 = vmatprep.subr.mxu1 %v1327_v43 }
 0x8aa   :  { %2124 = vmatpush3.msra.mxu1 %v1327_v43 }
 0x8ab   :  { %2125 = vmatprep.subr.mxu1 %v1326_v46 }
 0x8ac   :  { %2126 = vmatpush3.msra.mxu1 %v1326_v46 }
 0x8ad   :  { %2127 = vmatprep.subr.mxu1 %v1325_v39 }
 0x8ae   :  { %2128 = vmatpush3.msra.mxu1 %v1325_v39 }
 0x8af   :  { %2129 = vmatprep.subr.mxu1 %v1324_v49 }
 0x8b0   :  { %2130 = vmatpush3.msra.mxu1 %v1324_v49 }
 0x8b1   :  { %2131 = vmatprep.subr.mxu1 %v1323_v51 }
 0x8b2   :  { %2132 = vmatpush3.msra.mxu1 %v1323_v51 }
 0x8b3   :  { %2133 = vmatprep.subr.mxu1 %v1322_v53 }
 0x8b4   :  { %2134 = vmatpush3.msra.mxu1 %v1322_v53 }
 0x8b5   :  { %2135 = vmatprep.subr.mxu1 %v1321_v54 }
 0x8b6   :  { %2136 = vmatpush3.msra.mxu1 %v1321_v54 }
 0x8b7   :  { %2137 = vmatprep.subr.mxu1 %v1320_v55 }
 0x8b8   :  { %2138 = vmatpush3.msra.mxu1 %v1320_v55 }
 0x8b9   :  { %2140 = vmatmul.mubr.msk.f32.vlgmr.msra.gmra.mxu1 %vm327_vm2, %v2290_v57 }
 0x8ba   :  { %2142 = vmatprep.mubr.msk.f32.mxu1 %vm327_vm2, %v2295_v58 }
 0x8bd   :  { %2143 = vmatmul.mubr.msk.f32.gmra.mxu1 %vm327_vm2, %v2304_v59 }
 0x8be   :  { %2145 = vmatprep.mubr.msk.f32.mxu1 %vm327_vm2, %v2309_v60 }
 0x8c1   :  { %2146 = vmatmul.mubr.msk.f32.gmra.mxu1 %vm327_vm2, %v2318_v61 }
 0x8c2   :  { %2148 = vmatprep.mubr.msk.f32.mxu1 %vm327_vm2, %v2323_v62 }
 0x8c5   :  { %2149 = vmatmul.mubr.msk.f32.gmra.mxu1 %vm327_vm2, %v2332_v63 }
 0x979   :  { %v2141_v56 = vpop.f32.mrf.mxu1 }
 0x97a   :  { %v1434_v22 = vmul.f32 0.9, %v2141_v56 }
 0x97b   :  { %v1394_v0 = vpop.f32.mrf.mxu1 }
 0x97c   :  { %v1433_v25 = vmul.f32 0.9, %v1394_v0  ;;  %v1442_v28 = vadd.f32 %v1434_v22, %v2355_v26 }
 0x97d   :  { %v2144_v1 = vpop.f32.mrf.mxu1 }
 0x97e   :  { %v1436_v16 = vmul.f32 0.9, %v2144_v1  ;;  %v1441_v30 = vadd.f32 %v1433_v25, %v2358_v29 }
 0x97f   :  { %v1404_v2 = vpop.f32.mrf.mxu1 }
 0x980   :  { %v1435_v19 = vmul.f32 0.9, %v1404_v2  ;;  %v1444_v24 = vadd.f32 %v1436_v16, %v2349_v20 }
 0x981   :  { %v2147_v3 = vpop.f32.mrf.mxu1 }
 0x982   :  { %v1438_v9 = vmul.f32 0.9, %v2147_v3  ;;  %v1443_v27 = vadd.f32 %v1435_v19, %v2352_v23 }
 0x983   :  { %v1414_v4 = vpop.f32.mrf.mxu1 }
 0x984   :  { %v1437_v13 = vmul.f32 0.9, %v1414_v4  ;;  %v1446_v18 = vadd.f32 %v1438_v9, %v2343_v14 }
 0x985   :  { %v2150_v5 = vpop.f32.mrf.mxu1 }
 0x986   :  { %v1440_v6 = vmul.f32 0.9, %v2150_v5  ;;  %v1445_v21 = vadd.f32 %v1437_v13, %v2346_v17 }
 0x987   :  { %v1424_v8 = vpop.f32.mrf.mxu1 }
 0x988   :  { %v1448_v11 = vadd.f32 %v1440_v6, %v2338_v7  ;;  %v1439_v12 = vmul.f32 0.9, %v1424_v8 }
 0x98a   :  { %v1447_v15 = vadd.f32 %v1439_v12, %v2340_v10  ;;  %2151 = vmatprep.subr.mxu0 %v1448_v11 }
 0x98b   :  { %2152 = vmatpush3.msra.mxu0 %v1448_v11 }
 0x98c   :  { %2153 = vmatprep.subr.mxu0 %v1447_v15 }
 0x98d   :  { %2154 = vmatpush3.msra.mxu0 %v1447_v15 }
 0x98e   :  { %2155 = vmatprep.subr.mxu0 %v1446_v18 }
 0x98f   :  { %2156 = vmatpush3.msra.mxu0 %v1446_v18 }
 0x990   :  { %2157 = vmatprep.subr.mxu0 %v1445_v21 }
 0x991   :  { %2158 = vmatpush3.msra.mxu0 %v1445_v21 }
 0x992   :  { %2159 = vmatprep.subr.mxu0 %v1444_v24 }
 0x993   :  { %2160 = vmatpush3.msra.mxu0 %v1444_v24 }
 0x994   :  { %2161 = vmatprep.subr.mxu0 %v1443_v27 }
 0x995   :  { %2162 = vmatpush3.msra.mxu0 %v1443_v27 }
 0x996   :  { %2163 = vmatprep.subr.mxu0 %v1442_v28 }
 0x997   :  { %2164 = vmatpush3.msra.mxu0 %v1442_v28 }
 0x998   :  { %2165 = vmatprep.subr.mxu0 %v1441_v30 }
 0x999   :  { %2166 = vmatpush3.msra.mxu0 %v1441_v30 }
 0x99a   :  { %2168 = vmatmul.mubr.msk.f32.vlgmr.msra.gmra.mxu0 %vm327_vm2, %v2290_v57 }
 0x99b   :  { %2170 = vmatprep.mubr.msk.f32.mxu0 %vm327_vm2, %v2295_v58 }
 0x99e   :  { %2171 = vmatmul.mubr.msk.f32.gmra.mxu0 %vm327_vm2, %v2304_v59 }
 0x99f   :  { %2173 = vmatprep.mubr.msk.f32.mxu0 %vm327_vm2, %v2309_v60 }
 0x9a2   :  { %2174 = vmatmul.mubr.msk.f32.gmra.mxu0 %vm327_vm2, %v2318_v61 }
 0x9a3   :  { %2176 = vmatprep.mubr.msk.f32.mxu0 %vm327_vm2, %v2323_v62 }
 0x9a6   :  { %2177 = vmatmul.mubr.msk.f32.gmra.mxu0 %vm327_vm2, %v2332_v63 }
 0xa5a   :  { %v2169_v31 = vpop.f32.mrf.mxu0 }
 0xa5b   :  { %v1555_v57 = vmul.f32 0.9, %v2169_v31 }
 0xa5c   :  { %v1515_v32 = vpop.f32.mrf.mxu0 }
 0xa5d   :  { %v1563_v58 = vadd.f32 %v1555_v57, %v2355_v26  ;;  %v1554_v33 = vmul.f32 0.9, %v1515_v32 }
 0xa5e   :  { %v2172_v59 = vpop.f32.mrf.mxu0 }
 0xa5f   :  { %1572 = vst.msk [vmem:[%s2612_s6 + $0x8] sm:$0xff] %vm1570_vm3, %v1563_v58  ;;  %v1562_v60 = vadd.f32 %v1554_v33, %v2358_v29  ;;  %v1557_v61 = vmul.f32 0.9, %v2172_v59 }
 0xa60   :  { %v1525_v62 = vpop.f32.mrf.mxu0 }
 0xa61   :  { %1571 = vst.msk [vmem:[%s2612_s6] sm:$0xff] %vm1570_vm3, %v1562_v60  ;;  %v1565_v63 = vadd.f32 %v1557_v61, %v2349_v20  ;;  %v1556_v34 = vmul.f32 0.9, %v1525_v62 }
 0xa62   :  { %v2175_v26 = vpop.f32.mrf.mxu0 }
 0xa63   :  { %1574 = vst.msk [vmem:[%s2612_s6 + $0x18] sm:$0xff] %vm1570_vm3, %v1565_v63  ;;  %v1564_v35 = vadd.f32 %v1556_v34, %v2352_v23  ;;  %v1559_v36 = vmul.f32 0.9, %v2175_v26 }
 0xa64   :  { %v1535_v29 = vpop.f32.mrf.mxu0 }
 0xa65   :  { %1573 = vst.msk [vmem:[%s2612_s6 + $0x10] sm:$0xff] %vm1570_vm3, %v1564_v35  ;;  %v1567_v37 = vadd.f32 %v1559_v36, %v2343_v14  ;;  %v1558_v38 = vmul.f32 0.9, %v1535_v29 }
 0xa66   :  { %v2178_v20 = vpop.f32.mrf.mxu0 }
 0xa67   :  { %1576 = vst.msk [vmem:[%s2612_s6 + $0x28] sm:$0xff] %vm1570_vm3, %v1567_v37  ;;  %v1566_v40 = vadd.f32 %v1558_v38, %v2346_v17  ;;  %v1561_v41 = vmul.f32 0.9, %v2178_v20 }
 0xa68   :  { %v1545_v23 = vpop.f32.mrf.mxu0 }
 0xa69   :  { %1575 = vst.msk [vmem:[%s2612_s6 + $0x20] sm:$0xff] %vm1570_vm3, %v1566_v40  ;;  %v1569_v42 = vadd.f32 %v1561_v41, %v2338_v7  ;;  %v1560_v43 = vmul.f32 0.9, %v1545_v23 }
 0xa6b   :  { %1578 = vst.msk [vmem:[%s2612_s6 + $0x38] sm:$0xff] %vm1570_vm3, %v1569_v42  ;;  %v1568_v14 = vadd.f32 %v1560_v43, %v2340_v10 }
 0xa6d   :  { %1577 = vst.msk [vmem:[%s2612_s6 + $0x30] sm:$0xff] %vm1570_vm3, %v1568_v14 }

</bundles_post_ra>
